<compile_context>
chip_gen: v5e
topology: v5e:2x2
jax: 0.10.0
libtpu: 0.0.40
codegen_flags: <defaults>
</compile_context>

<pallas_src>
import jax
import jax.numpy as jnp
from jax.experimental import pallas as pl
from jax.experimental.pallas import tpu as pltpu


def _im2seq_kernel(x_ref, o_ref):
    # x_ref: (tc, tw) tile of the (C, W) slab; o_ref: (tw, tc) tile of (W, C).
    # The tile transpose (XLU) is the only data movement.
    o_ref[...] = jnp.swapaxes(x_ref[...], 0, 1)


def _pick_tile(dim, itemsize):
    """Tile size: full dim when <= 128, else a multiple of 128 (bounded cap)."""
    if dim <= 128:
        return dim                        # full-dim block: always layout-legal
    cap = 512 if itemsize >= 4 else 1024  # keep a tile around 1-2 MiB
    mult = (min(dim, cap) // 128) * 128   # largest multiple of 128 <= min(dim, cap)
    return max(mult, 128)


def im2seq(x):
    """x: (B, C, H, W) with H == 1  ->  (B, W, C)."""
    B, C, H, W = x.shape
    assert H == 1, "Im2Seq requires H == 1"
    x3 = x.reshape(B, C, W)               # squeeze(dim=2): pure metadata

    itemsize = jnp.dtype(x.dtype).itemsize
    tc = _pick_tile(C, itemsize)          # C-tile (output lane dim)
    tw = _pick_tile(W, itemsize)          # W-tile (input lane dim)
    grid = (B, pl.cdiv(W, tw), pl.cdiv(C, tc))

    cost = pl.CostEstimate(
        flops=0,
        transcendentals=0,
        bytes_accessed=2 * B * C * W * itemsize,   # one read + one write
    )

    out = pl.pallas_call(
        _im2seq_kernel,
        out_shape=jax.ShapeDtypeStruct((B, W, C), x.dtype),
        grid_spec=pltpu.PrefetchScalarGridSpec(
            num_scalar_prefetch=0,
            grid=grid,
            in_specs=[
                pl.BlockSpec((pl.Squeezed(), tc, tw),
                             lambda b, wi, ci: (b, ci, wi)),
            ],
            out_specs=pl.BlockSpec((pl.Squeezed(), tw, tc),
                                   lambda b, wi, ci: (b, wi, ci)),
        ),
        compiler_params=pltpu.CompilerParams(
            # Every grid point writes a distinct output tile -> fully parallel.
            dimension_semantics=("parallel", "parallel", "parallel"),
        ),
        cost_estimate=cost,
    )(x3)
    return out


class Im2Seq:
    """Mirror of the PyTorch module (no parameters)."""

    def __init__(self, in_channels, **kwargs):
        self.out_channels = in_channels

    def __call__(self, x):
        return im2seq(x)


def _reference(x):
    B, C, H, W = x.shape
    return jnp.transpose(x.reshape(B, C, W), (0, 2, 1))


if __name__ == "__main__":
    key = jax.random.PRNGKey(0)

    # Small shape matching the module's expected input (B, C, 1, W).
    B, C, H, W = 2, 4, 1, 16
    x_small = jax.random.normal(key, (B, C, H, W), dtype=jnp.float32)
    model = Im2Seq(in_channels=C)
    y_small = jax.block_until_ready(model(x_small))
    assert y_small.shape == (B, W, C), y_small.shape
    assert y_small.dtype == x_small.dtype
    assert jnp.array_equal(y_small, _reference(x_small)), "small-shape mismatch"

    # Larger shape exercising the tiled multi-step pipeline path:
    # tiles (tc, tw) = (256, 512) -> grid (1, 2, 1).
    B2, C2, W2 = 1, 256, 1024
    x_big = jax.random.normal(jax.random.PRNGKey(0), (B2, C2, 1, W2),
                              dtype=jnp.float32)
    y_big = jax.block_until_ready(im2seq(x_big))
    assert y_big.shape == (B2, W2, C2), y_big.shape
    assert jnp.array_equal(y_big, _reference(x_big)), "tiled-shape mismatch"

    # Non-aligned shape exercising partial edge blocks:
    # C=96 (full-dim tile), W=200 -> tw=128, grid (2, 2, 1) with a ragged W tile.
    B3, C3, W3 = 2, 96, 200
    x_odd = jax.random.normal(jax.random.PRNGKey(0), (B3, C3, 1, W3),
                              dtype=jnp.float32)
    y_odd = jax.block_until_ready(im2seq(x_odd))
    assert y_odd.shape == (B3, W3, C3), y_odd.shape
    assert jnp.array_equal(y_odd, _reference(x_odd)), "ragged-shape mismatch"

    print("KERNEL_OK")
</pallas_src>

<mosaic_0001>
module attributes {stable_mosaic.version = 11 : i64} {
  func.func @_im2seq_kernel(%arg0: i32, %arg1: i32, %arg2: i32, %arg3: memref<1x4x16xf32, #tpu.memory_space<vmem>>, %arg4: memref<1x16x4xf32, #tpu.memory_space<vmem>>) attributes {dimension_semantics = [#tpu.dimension_semantics<parallel>, #tpu.dimension_semantics<parallel>, #tpu.dimension_semantics<parallel>], iteration_bounds = array<i64: 2, 1, 1>, scalar_prefetch = 0 : i64, scratch_operands = 0 : i64, tpu.core_type = #tpu.core_type<tc>, window_params = [{transform_indices = @transform_0, window_bounds = array<i64: 1, 4, 16>}, {transform_indices = @transform_1, window_bounds = array<i64: 1, 16, 4>}]} {
    %c0 = arith.constant 0 : index
    %c0_0 = arith.constant 0 : index
    %c0_1 = arith.constant 0 : index
    %0 = vector.load %arg3[%c0, %c0_0, %c0_1] : memref<1x4x16xf32, #tpu.memory_space<vmem>>, vector<1x4x16xf32>
    %1 = vector.shape_cast %0 : vector<1x4x16xf32> to vector<4x16xf32>
    %2 = tpu.transpose %1, [1, 0] : vector<4x16xf32> -> vector<16x4xf32>
    %c0_2 = arith.constant 0 : index
    %c0_3 = arith.constant 0 : index
    %c0_4 = arith.constant 0 : index
    %3 = vector.load %arg4[%c0_2, %c0_3, %c0_4] : memref<1x16x4xf32, #tpu.memory_space<vmem>>, vector<1x16x4xf32>
    %4 = vector.shape_cast %3 : vector<1x16x4xf32> to vector<16x4xf32>
    %5 = vector.shape_cast %2 : vector<16x4xf32> to vector<1x16x4xf32>
    tpu.vector_store %arg4[%c0_2, %c0_3, %c0_4], %5 {strides = array<i32>} : memref<1x16x4xf32, #tpu.memory_space<vmem>>, vector<1x16x4xf32>,
    return
  }
  func.func @transform_0(%arg0: i32, %arg1: i32, %arg2: i32) -> (i32, i32, i32) {
    %c0_i32 = arith.constant 0 : i32
    return %arg0, %arg2, %arg1 : i32, i32, i32
  }
  func.func @transform_1(%arg0: i32, %arg1: i32, %arg2: i32) -> (i32, i32, i32) {
    %c0_i32 = arith.constant 0 : i32
    return %arg0, %arg1, %arg2 : i32, i32, i32
  }
}

</mosaic_0001>

<bundles_post_ra>
// kernel: tpu_custom_call.1
= control target key start
LH: loop header
LB: loop body
LE: loop exit
PB: predicated region body
PF: predicated region fallthrough
CT: control target
= control target key end

     0   :  { %6 = vsyncpa [#allocation3], 0  ;;  %s572_s0 = inlined_call_operand.hbm [shape: f32[2,4,16], index: 0, kind: input, shape index: {}]   ;;  %s573_s1 = inlined_call_operand.vmem [shape: f32[2,16,4], index: 1, kind: output, shape index: {}]  }
   0x1   :  { %8 = vsyncpa [#allocation3 + $0x1], 0  ;;  %s484_s6 = smov 0   ;;  %s486_s7 = smov 0  }
   0x2   :  { %s488_s8 = smov 0   ;;  %s490_s9 = smov 0  }
   0x3   :  { %s492_s10 = smov 0   ;;  %s494_s11 = smov 0  }
   0x4 LB: > { %s323_s12 = sadd.s32 4294967295, %s472_s11   ;;  %s33_s13 = sadd.s32 1, %s468_s10  ;;  %s472_s11 = sphi %s494_s11, %s14_s11   ;;  %s468_s10 = sphi %s492_s10, %s580_s10   ;;  %s464_s9 = sphi %s490_s9, %s579_s9   ;;  %s460_s8 = sphi %s488_s8, %s578_s8   ;;  %s456_s7 = sphi %s486_s7, %s577_s7   ;;  %s452_s6 = sphi %s484_s6, %s576_s6  }
   0x5   : > { %p35_p0 = scmp.ge.s32.totalorder %s33_s13, 2  ;;  %s44_s14 = sadd.s32 1, %s460_s8 }
   0x6   : > { %p51_p1 = scmp.ne.s32.totalorder %s460_s8, %s456_s7  ;;  %p52_p2 = scmp.eq.s32.totalorder %s472_s11, 0 }
   0x7   : > { %s582_s13 = smov (%p35_p0, %s33_s13), 0  ;;  %p57_p4 = scmp.ne.s32.totalorder %s456_s7, %s452_s6 }
   0x8   : > { %p520_p3 = por %p52_p2, %p51_p1  ;;  %s37_s16 = ssub.s32 %s468_s10, %s582_s13 }
   0x9   : > { %p58_p5 = scmp.eq.s32.totalorder %s323_s12, 0  ;;  %p42_p6 = scmp.eq.s32.totalorder %s37_s16, 0 }
   0xa   : > { %p342_p8 = scmp.lt.s32.totalorder %s472_s11, 2  ;;  %s111_s19 = sand.u32 1, %s460_s8  }
   0xb   : > { %p527_p7 = por %p58_p5, %p57_p4  ;;  %s328_s20 = sshll.u32 %s468_s10, 2 }
   0xc   : > { %s533_s18 = scalar_select %p42_p6, %s460_s8, %s44_s14  }
   0xd   : > { %s327_s21 = sshll.u32 %s111_s19, 2  ;;  %s121_s24 = scalar_lea.hbm %s572_s0, %s328_s20 }
   0xe   : > { %s123_s25 = sshll.u32 %s121_s24, 4  ;;  %s115_s26 = scalar_lea.vmem [#allocation2], %s327_s21  ;;  %s124_s25 = int_to_ptr.hbm [resolvable:$true] %s123_s25 }
   0xf   : > { %s125_s27 = sshll.u32 %s115_s26, 4  ;;  %p339_p9 = pnand %p342_p8, %p520_p3  ;;  %s126_s27 = int_to_ptr.vmem [resolvable:$true] %s125_s27 }
  0x10   : > { %p329_p10 = scmp.ge.s32.totalorder %s472_s11, 1  ;;  %p130_p11 = scmp.lt.s32.totalorder %s472_s11, 3 }
  0x11   : > { %s112_s28 = scalar_lea.sflag [#allocation3], %s111_s19 }
  0x12   : > { %341 = dma.hbm_to_vmem [thread:$0]  (!%p339_p9), %s124_s25, 64, %s126_s27, %s112_s28  }
  0x13   : > { %p131_p12 = pnand %p329_p10, %p130_p11 }
  0x14   : > { %s136_s29 = sand.u32 (!%p131_p12), 1, %s456_s7  }
  0x15   : > { %134 = sbr.rel (%p131_p12) target bundleno = 202 (0xca), region = 24  ;;  %s330_s30 = sshll.u32 (!%p131_p12), %s136_s29, 2 }
  0x16   : > { %s137_s2 = scalar_lea.sflag (!%p131_p12), [#allocation3], %s136_s29  ;;  %s140_s3 = scalar_lea.vmem (!%p131_p12), [#allocation2], %s330_s30 }
  0x1a   : > { %447 = dma.done.wait (%p527_p7), %s137_s2, 64  }
  0x1b   : > { %449 = vsyncadd (%p527_p7), %s137_s2, 4294967232  ;;  %v180_v0 = vld [vmem:[%s140_s3] sm:$0xf]  ;;  %p168_p13 = scmp.lt.s32.totalorder %s464_s9, 1  ;;  %vm213_vm0 = vcmask 31744  }
  0x1c   : > { %181 = vxpose.xlu0.b32.start.end [1/1] (short) (narrow) %v180_v0, 16 }
  0x1d   : > { %s584_s9 = smov (!%p168_p13, %s464_s9), 1 }
  0x1e   : > { %s335_s4 = sshll.u32 %s584_s9, 4 }
  0x1f   : > { %s178_s12 = scalar_lea.vmem %s573_s1, %s335_s4 }
  0xc0   : > { %v197_v1 = vpop.trf.xlu0 }
  0xc1   : > { %214 = vst.msk [vmem:[%s178_s12] sm:$0xff] %vm213_vm0, %v197_v1 }
  0xc8   : > { %v198_v2 = vpop.trf.xlu0 }
  0xc9   : > { %215 = vst.msk [vmem:[%s178_s12 + $0x8] sm:$0xff] %vm213_vm0, %v198_v2 }
  0xca PF: > { %s14_s11 = sadd.s32 1, %s472_s11   ;;  %s576_s6 = smov %s456_s7 }
  0xcb   : > { %p11_p0 = scmp.ge.s32.totalorder %s14_s11, 4   ;;  %s577_s7 = smov %s460_s8 }
  0xcc   : > { %s578_s8 = smov %s533_s18  ;;  %s579_s9 = smov %s468_s10 }
  0xcd   : > { %s580_s10 = smov %s582_s13  ;;  %13 = sbr.rel (!%p11_p0) target bundleno = 4 (0x4), region = 64 }
  0xd2   :  { %252 = vsyncpa [#allocation3], 1 }
  0xd3   :  { %254 = vsyncpa [#allocation3 + $0x1], 1 }

</bundles_post_ra>
